<compile_context>
chip_gen: v7x
topology: tpu7x:2x2x1
jax: 0.10.0
libtpu: 0.0.40
codegen_flags: <defaults>
</compile_context>

<pallas_src>
import functools

import jax
import jax.numpy as jnp
from jax.experimental import pallas as pl
from jax.experimental.pallas import tpu as pltpu


def _scatter_kernel(gid_ref, vblk_ref, valid_ref, first_ref, last_ref,
                    rows_ref, featT_ref, out_ref, acc_ref,
                    *, tile_s, onehot_dtype):
    """One grid step = one (group, voxel-tile) schedule entry.

    gid_ref/vblk_ref/valid_ref/first_ref/last_ref: SMEM (T,) int32 schedule
    rows_ref:  VMEM (TV, 1) int32 — global flat row id of each voxel
    featT_ref: VMEM (C, TV)       — transposed (sorted, padded) features
    out_ref:   VMEM (1, C, TS)    — channel-first output tile of group gid
    acc_ref:   VMEM (C, TS) f32   — lane-dense accumulator
    """
    t = pl.program_id(0)

    @pl.when(first_ref[t] == 1)
    def _init():
        acc_ref[...] = jnp.zeros_like(acc_ref)

    @pl.when(valid_ref[t] == 1)
    def _accumulate():
        # Global row offset of this output tile.  rows_pad is a multiple of
        # tile_s, so base == gid * tile_s.
        base = gid_ref[t] * tile_s
        local = rows_ref[...] - base                             # (TV, 1), tiny
        lane = jax.lax.broadcasted_iota(jnp.int32, (1, tile_s), 1)  # (1, TS)
        # Broadcast compare -> (TV, TS) one-hot; wrong-tile / padded voxels
        # (row -1) never match; duplicates sum through the contraction.
        onehot_t = (local == lane).astype(onehot_dtype)
        acc_ref[...] += jnp.dot(featT_ref[...], onehot_t,
                                preferred_element_type=jnp.float32)

    @pl.when(last_ref[t] == 1)
    def _writeback():
        out_ref[0, :, :] = acc_ref[...].astype(out_ref.dtype)


def _round_up(x, m):
    return ((x + m - 1) // m) * m


def _pick_voxel_tile(n, target=512):
    tv = 128
    while tv * 2 <= target and tv < n:
        tv *= 2
    return tv


def _hw_targets():
    """(spatial tile target, vmem_limit_bytes) — generation aware, v7x-safe fallback."""
    try:
        cap = int(pltpu.get_tpu_info().vmem_capacity_bytes)
    except Exception:
        cap = 64 * 1024 * 1024                 # assume v7x (64 MiB / TC)
    if cap >= 96 * 1024 * 1024:                # v5e / v6e: 128 MiB
        return 4096, 64 * 1024 * 1024
    return 2048, 48 * 1024 * 1024              # v7x


def sparse_point_pillars_scatter(voxel_features, coors, batch_size,
                                 output_shape=(16, 16), use_bf16_matmul=False):
    """Dense-equivalent of SparsePointPillarsScatter.forward.

    Returns (batch_size, ny, nx, C): voxel features scattered (duplicates
    accumulated) at (batch, y, x) from coors[:, [0, 2, 3]].
    """
    ny, nx = output_shape
    n, c = voxel_features.shape
    rows_per_batch = ny * nx

    ts_target, vmem_limit = _hw_targets()

    # ---- Spatial tiling: pad the per-batch canvas to a multiple of the tile
    # (fixes the non-divisible-canvas / full-extent-accumulator hazard).
    tile_s = min(ts_target, _round_up(rows_per_batch, 128))
    n_sblocks = pl.cdiv(rows_per_batch, tile_s)
    rows_pad = n_sblocks * tile_s              # per-batch padded row count
    n_groups = batch_size * n_sblocks          # one group per (batch, spatial tile)

    # ---- Global flat row per voxel, sorted (batch-major, row-major).
    coors = coors.astype(jnp.int32)
    global_rows = (coors[:, 0] * rows_pad + coors[:, 2] * nx + coors[:, 3]).astype(jnp.int32)
    order = jnp.argsort(global_rows)
    rows_sorted = global_rows[order]
    feats = voxel_features[order]

    # ---- Voxel tiling.
    tile_v = _pick_voxel_tile(n)
    n_pad = pl.cdiv(n, tile_v) * tile_v
    n_vblocks = n_pad // tile_v
    pad = n_pad - n
    # Padded voxels: row -1 never matches; features are zero (double safety).
    rows_col = jnp.pad(rows_sorted, (0, pad), constant_values=-1).reshape(n_pad, 1)
    featT = jnp.pad(feats, ((0, pad), (0, 0))).T               # (C, n_pad)

    onehot_dtype = featT.dtype
    if use_bf16_matmul and featT.dtype == jnp.float32:
        # Opt-in precision trade-off: bf16 MXU rate, one-hot exact, f32 accum.
        featT = featT.astype(jnp.bfloat16)
        onehot_dtype = jnp.bfloat16

    # ---- Per-group voxel-tile windows.  Group g covers global rows
    # [g*tile_s, (g+1)*tile_s) because rows_pad == n_sblocks * tile_s.
    bounds = jnp.searchsorted(
        rows_sorted, jnp.arange(n_groups + 1, dtype=jnp.int32) * tile_s).astype(jnp.int32)
    lo, hi = bounds[:-1], bounds[1:]
    win_start = (lo // tile_v).astype(jnp.int32)
    win_count = jnp.where(hi > lo,
                          (hi + tile_v - 1) // tile_v - lo // tile_v,
                          0).astype(jnp.int32)

    # ---- Flattened schedule: every group gets max(win_count, 1) steps.
    # Static bound: sum(steps) <= n_groups + n_vblocks (window block ranges of
    # consecutive groups overlap by at most one tile).
    steps = jnp.maximum(win_count, 1)
    total = n_groups + n_vblocks
    off = jnp.concatenate([jnp.zeros((1,), jnp.int32),
                           jnp.cumsum(steps).astype(jnp.int32)])
    t_idx = jnp.arange(total, dtype=jnp.int32)
    gid = jnp.clip(jnp.searchsorted(off, t_idx, side='right').astype(jnp.int32) - 1,
                   0, n_groups - 1)
    k = t_idx - off[gid]
    sched_gid = gid
    sched_vblk = jnp.clip(win_start[gid] + k, 0, n_vblocks - 1).astype(jnp.int32)
    sched_valid = (k < win_count[gid]).astype(jnp.int32)
    prev_gid = jnp.concatenate([jnp.full((1,), -1, jnp.int32), gid[:-1]])
    next_gid = jnp.concatenate([gid[1:], jnp.full((1,), -2, jnp.int32)])
    sched_first = (gid != prev_gid).astype(jnp.int32)
    sched_last = (gid != next_gid).astype(jnp.int32)
    # Trailing padded steps repeat the last group with valid=0/first=0; the
    # final one carries last=1 and just re-emits the finished accumulator.

    kernel = functools.partial(_scatter_kernel, tile_s=tile_s,
                               onehot_dtype=onehot_dtype)

    out_tiles = pl.pallas_call(
        kernel,
        out_shape=jax.ShapeDtypeStruct((n_groups, c, tile_s),
                                       voxel_features.dtype),
        grid_spec=pltpu.PrefetchScalarGridSpec(
            num_scalar_prefetch=5,             # gid, vblk, valid, first, last
            grid=(total,),
            in_specs=[
                pl.BlockSpec((tile_v, 1),
                             lambda t, g, v, va, fi, la: (v[t], 0)),
                pl.BlockSpec((c, tile_v),
                             lambda t, g, v, va, fi, la: (0, v[t])),
            ],
            out_specs=pl.BlockSpec((1, c, tile_s),
                                   lambda t, g, v, va, fi, la: (g[t], 0, 0)),
            scratch_shapes=[pltpu.VMEM((c, tile_s), jnp.float32)],
        ),
        compiler_params=pltpu.CompilerParams(
            dimension_semantics=("arbitrary",),
            vmem_limit_bytes=vmem_limit),
    )(sched_gid, sched_vblk, sched_valid, sched_first, sched_last,
      rows_col, featT)

    # (G, C, TS) -> (B, ny, nx, C): wrapper-side layout plumbing keeps every
    # in-kernel store lane-dense.
    out = out_tiles.reshape(batch_size, n_sblocks, c, tile_s)
    out = jnp.transpose(out, (0, 2, 1, 3)).reshape(batch_size, c, rows_pad)
    out = out[:, :, :rows_per_batch].reshape(batch_size, c, ny, nx)
    return jnp.transpose(out, (0, 2, 3, 1))


if __name__ == "__main__":
    key = jax.random.PRNGKey(0)
    k1, k2, k3, k4, k5 = jax.random.split(key, 5)

    batch_size = 2
    in_channels = 8
    ny, nx = 16, 16
    n_voxels = 12

    voxel_features = jax.random.normal(k1, (n_voxels, in_channels),
                                       dtype=jnp.float32)
    batch_ids = jax.random.randint(k2, (n_voxels,), 0, batch_size)
    z_ids = jax.random.randint(k3, (n_voxels,), 0, 1)
    y_ids = jax.random.randint(k4, (n_voxels,), 0, ny)
    x_ids = jax.random.randint(k5, (n_voxels,), 0, nx)
    coors = jnp.stack([batch_ids, z_ids, y_ids, x_ids], axis=1).astype(jnp.int32)

    out = sparse_point_pillars_scatter(voxel_features, coors, batch_size,
                                       output_shape=(ny, nx))
    out = jax.block_until_ready(out)

    # Pure-JAX reference: dense scatter-add (== sparse_coo_tensor(...).to_dense()).
    ref = jnp.zeros((batch_size, ny, nx, in_channels), dtype=jnp.float32)
    ref = ref.at[coors[:, 0], coors[:, 2], coors[:, 3]].add(voxel_features)

    assert out.shape == (batch_size, ny, nx, in_channels)
    assert jnp.allclose(out, ref, atol=1e-5, rtol=1e-5), "mismatch vs reference scatter"
    print("KERNEL_OK")
</pallas_src>

<mosaic_0001>
module attributes {stable_mosaic.version = 11 : i64} {
  func.func @_scatter_kernel(%arg0: i32, %arg1: memref<3xi32, #tpu.memory_space<smem>>, %arg2: memref<3xi32, #tpu.memory_space<smem>>, %arg3: memref<3xi32, #tpu.memory_space<smem>>, %arg4: memref<3xi32, #tpu.memory_space<smem>>, %arg5: memref<3xi32, #tpu.memory_space<smem>>, %arg6: memref<128x1xi32, #tpu.memory_space<vmem>>, %arg7: memref<8x128xf32, #tpu.memory_space<vmem>>, %arg8: memref<1x8x256xf32, #tpu.memory_space<vmem>>, %arg9: memref<8x256xf32, #tpu.memory_space<vmem>>) attributes {dimension_semantics = [#tpu.dimension_semantics<arbitrary>], iteration_bounds = array<i64: 3>, scalar_prefetch = 5 : i64, scratch_operands = 1 : i64, tpu.core_type = #tpu.core_type<tc>, window_params = [{transform_indices = @transform_0, window_bounds = array<i64: 128, 1>}, {transform_indices = @transform_1, window_bounds = array<i64: 8, 128>}, {transform_indices = @transform_2, window_bounds = array<i64: 1, 8, 256>}]} {
    %0 = arith.index_cast %arg0 : i32 to index
    %1 = memref.load %arg4[%0] : memref<3xi32, #tpu.memory_space<smem>>
    %c1_i32 = arith.constant 1 : i32
    %2 = arith.cmpi eq, %1, %c1_i32 : i32
    %3 = arith.extui %2 : i1 to i32
    %c0_i32 = arith.constant 0 : i32
    %4 = arith.cmpi ne, %3, %c0_i32 : i32
    scf.if %4 {
      %cst = arith.constant 0.000000e+00 : f32
      %15 = vector.broadcast %cst : f32 to vector<8x256xf32>
      %c0 = arith.constant 0 : index
      %c0_4 = arith.constant 0 : index
      %16 = vector.load %arg9[%c0, %c0_4] : memref<8x256xf32, #tpu.memory_space<vmem>>, vector<8x256xf32>
      tpu.vector_store %arg9[%c0, %c0_4], %15 {strides = array<i32>} : memref<8x256xf32, #tpu.memory_space<vmem>>, vector<8x256xf32>,
    } else {
    }
    %5 = arith.index_cast %arg0 : i32 to index
    %6 = memref.load %arg3[%5] : memref<3xi32, #tpu.memory_space<smem>>
    %c1_i32_0 = arith.constant 1 : i32
    %7 = arith.cmpi eq, %6, %c1_i32_0 : i32
    %8 = arith.extui %7 : i1 to i32
    %c0_i32_1 = arith.constant 0 : i32
    %9 = arith.cmpi ne, %8, %c0_i32_1 : i32
    scf.if %9 {
      %15 = arith.index_cast %arg0 : i32 to index
      %16 = memref.load %arg1[%15] : memref<3xi32, #tpu.memory_space<smem>>
      %c256_i32 = arith.constant 256 : i32
      %17 = arith.muli %16, %c256_i32 : i32
      %c0 = arith.constant 0 : index
      %c0_4 = arith.constant 0 : index
      %18 = vector.load %arg6[%c0, %c0_4] : memref<128x1xi32, #tpu.memory_space<vmem>>, vector<128x1xi32>
      %19 = vector.broadcast %17 : i32 to vector<128x1xi32>
      %20 = arith.subi %18, %19 : vector<128x1xi32>
      %21 = tpu.iota {dimensions = array<i32: 1>} : vector<1x256xi32>
      %22 = vector.broadcast %20 : vector<128x1xi32> to vector<128x256xi32>
      %23 = vector.broadcast %21 : vector<1x256xi32> to vector<128x256xi32>
      %24 = arith.cmpi eq, %22, %23 : vector<128x256xi32>
      %25 = arith.extui %24 : vector<128x256xi1> to vector<128x256xi32>
      %26 = arith.sitofp %25 : vector<128x256xi32> to vector<128x256xf32>
      %c0_5 = arith.constant 0 : index
      %c0_6 = arith.constant 0 : index
      %27 = vector.load %arg9[%c0_5, %c0_6] : memref<8x256xf32, #tpu.memory_space<vmem>>, vector<8x256xf32>
      %c0_7 = arith.constant 0 : index
      %c0_8 = arith.constant 0 : index
      %28 = vector.load %arg7[%c0_7, %c0_8] : memref<8x128xf32, #tpu.memory_space<vmem>>, vector<8x128xf32>
      %cst = arith.constant dense<0.000000e+00> : vector<8x256xf32>
      %29 = tpu.matmul %28, %26, %cst {dimension_numbers = #tpu.dot_dimension_numbers<[1], [0], [0], [1], [0, 0, 1, 1], [], []>} : vector<8x128xf32>, vector<128x256xf32>, vector<8x256xf32> -> vector<8x256xf32>
      %30 = arith.addf %27, %29 : vector<8x256xf32>
      %c0_9 = arith.constant 0 : index
      %c0_10 = arith.constant 0 : index
      %31 = vector.load %arg9[%c0_9, %c0_10] : memref<8x256xf32, #tpu.memory_space<vmem>>, vector<8x256xf32>
      tpu.vector_store %arg9[%c0_9, %c0_10], %30 {strides = array<i32>} : memref<8x256xf32, #tpu.memory_space<vmem>>, vector<8x256xf32>,
    } else {
    }
    %10 = arith.index_cast %arg0 : i32 to index
    %11 = memref.load %arg5[%10] : memref<3xi32, #tpu.memory_space<smem>>
    %c1_i32_2 = arith.constant 1 : i32
    %12 = arith.cmpi eq, %11, %c1_i32_2 : i32
    %13 = arith.extui %12 : i1 to i32
    %c0_i32_3 = arith.constant 0 : i32
    %14 = arith.cmpi ne, %13, %c0_i32_3 : i32
    scf.if %14 {
      %c0 = arith.constant 0 : index
      %c0_4 = arith.constant 0 : index
      %15 = vector.load %arg9[%c0, %c0_4] : memref<8x256xf32, #tpu.memory_space<vmem>>, vector<8x256xf32>
      %c0_5 = arith.constant 0 : index
      %c0_6 = arith.constant 0 : index
      %c0_7 = arith.constant 0 : index
      %16 = vector.load %arg8[%c0_5, %c0_6, %c0_7] : memref<1x8x256xf32, #tpu.memory_space<vmem>>, vector<1x8x256xf32>
      %17 = vector.shape_cast %16 : vector<1x8x256xf32> to vector<8x256xf32>
      %18 = vector.shape_cast %15 : vector<8x256xf32> to vector<1x8x256xf32>
      tpu.vector_store %arg8[%c0_5, %c0_6, %c0_7], %18 {strides = array<i32>} : memref<1x8x256xf32, #tpu.memory_space<vmem>>, vector<1x8x256xf32>,
    } else {
    }
    return
  }
  func.func @transform_0(%arg0: i32, %arg1: memref<3xi32, #tpu.memory_space<smem>>, %arg2: memref<3xi32, #tpu.memory_space<smem>>, %arg3: memref<3xi32, #tpu.memory_space<smem>>, %arg4: memref<3xi32, #tpu.memory_space<smem>>, %arg5: memref<3xi32, #tpu.memory_space<smem>>) -> (i32, i32) {
    %0 = arith.index_cast %arg0 : i32 to index
    %1 = memref.load %arg2[%0] : memref<3xi32, #tpu.memory_space<smem>>
    %c0_i32 = arith.constant 0 : i32
    %c0_i32_0 = arith.constant 0 : i32
    return %1, %c0_i32 : i32, i32
  }
  func.func @transform_1(%arg0: i32, %arg1: memref<3xi32, #tpu.memory_space<smem>>, %arg2: memref<3xi32, #tpu.memory_space<smem>>, %arg3: memref<3xi32, #tpu.memory_space<smem>>, %arg4: memref<3xi32, #tpu.memory_space<smem>>, %arg5: memref<3xi32, #tpu.memory_space<smem>>) -> (i32, i32) {
    %0 = arith.index_cast %arg0 : i32 to index
    %1 = memref.load %arg2[%0] : memref<3xi32, #tpu.memory_space<smem>>
    %c0_i32 = arith.constant 0 : i32
    %c0_i32_0 = arith.constant 0 : i32
    return %c0_i32, %1 : i32, i32
  }
  func.func @transform_2(%arg0: i32, %arg1: memref<3xi32, #tpu.memory_space<smem>>, %arg2: memref<3xi32, #tpu.memory_space<smem>>, %arg3: memref<3xi32, #tpu.memory_space<smem>>, %arg4: memref<3xi32, #tpu.memory_space<smem>>, %arg5: memref<3xi32, #tpu.memory_space<smem>>) -> (i32, i32, i32) {
    %0 = arith.index_cast %arg0 : i32 to index
    %1 = memref.load %arg1[%0] : memref<3xi32, #tpu.memory_space<smem>>
    %c0_i32 = arith.constant 0 : i32
    %c0_i32_0 = arith.constant 0 : i32
    %c0_i32_1 = arith.constant 0 : i32
    return %1, %c0_i32, %c0_i32_0 : i32, i32, i32
  }
}

</mosaic_0001>

<bundles_post_ra>
// kernel: tpu_custom_call.1
= control target key start
LH: loop header
LB: loop body
LE: loop exit
PB: predicated region body
PF: predicated region fallthrough
CT: control target
= control target key end

     0   :  { %s1117_s0 = inlined_call_operand.vmem [shape: s32[3], index: 0, kind: input, shape index: {}]   ;;  %s1118_s5 = inlined_call_operand.vmem [shape: s32[128,1], index: 5, kind: input, shape index: {}]   ;;  %s1119_s6 = inlined_call_operand.vmem [shape: f32[8,128], index: 6, kind: input, shape index: {}]   ;;  %s1120_s7 = inlined_call_operand.hbm [shape: f32[2,8,256], index: 7, kind: output, shape index: {}]   ;;  %s1121_s1 = inlined_call_operand.vmem [shape: s32[3], index: 1, kind: input, shape index: {}]   ;;  %s1122_s2 = inlined_call_operand.vmem [shape: s32[3], index: 2, kind: input, shape index: {}]   ;;  %s1123_s3 = inlined_call_operand.vmem [shape: s32[3], index: 3, kind: input, shape index: {}]   ;;  %s1124_s4 = inlined_call_operand.vmem [shape: s32[3], index: 4, kind: input, shape index: {}]  }
   0x1   :  { %s12_s26 = sshll.u32 %s1117_s0, 4  ;;  %s16_s29 = sshll.u32 %s1121_s1, 4  ;;  %s13_s26 = int_to_ptr.vmem [resolvable:$true] %s12_s26  ;;  %s17_s29 = int_to_ptr.vmem [resolvable:$true] %s16_s29 }
   0x2   :  { %s739_s30 = scalar_lea.vmem %s13_s26, 16  ;;  %p744_p1 = scmp.lt.s32.totalorder %s13_s26, %s13_s26 }
   0x3   :  { %p740_p0 = scmp.ne.s32.totalorder %s13_s26, %s739_s30  ;;  %p745_p2 = scmp.lt.s32.totalorder %s739_s30, %s739_s30 }
   0x5   :  { %p746_p3 = por %p745_p2, %p744_p1 }
   0x7   :  { %p747_p4 = pnand %p746_p3, %p740_p0 }
   0x9   :  { %750 = shalt.err (!%p747_p4)  }
   0xa   :  { %s865_s8 = smov [#allocation4]   ;;  %s751_s9 = scalar_lea.vmem %s17_s29, 16 }
   0xb   :  { %15 = dma.vmem_to_smem %s13_s26, 16, %s865_s8, [#allocation3] }
   0xc   :  { %p752_p5 = scmp.ne.s32.totalorder %s17_s29, %s751_s9  ;;  %p756_p6 = scmp.lt.s32.totalorder %s17_s29, %s17_s29 }
   0xd   :  { %p757_p7 = scmp.lt.s32.totalorder %s751_s9, %s751_s9 }
   0xf   :  { %p758_p8 = por %p757_p7, %p756_p6 }
  0x11   :  { %p759_p9 = pnand %p758_p8, %p752_p5 }
  0x13   :  { %762 = shalt.err (!%p759_p9)  }
  0x14   :  { %s866_s0 = smov [#allocation5]   ;;  %s20_s11 = sshll.u32 %s1122_s2, 4  ;;  %s21_s11 = int_to_ptr.vmem [resolvable:$true] %s20_s11 }
  0x15   :  { %19 = dma.vmem_to_smem %s17_s29, 16, %s866_s0, [#allocation3] }
  0x16   :  { %s24_s14 = sshll.u32 %s1123_s3, 4  ;;  %s763_s15 = scalar_lea.vmem %s21_s11, 16  ;;  %s25_s14 = int_to_ptr.vmem [resolvable:$true] %s24_s14 }
  0x17   :  { %p764_p10 = scmp.ne.s32.totalorder %s21_s11, %s763_s15  ;;  %p768_p11 = scmp.lt.s32.totalorder %s21_s11, %s21_s11 }
  0x18   :  { %p769_p12 = scmp.lt.s32.totalorder %s763_s15, %s763_s15 }
  0x1a   :  { %p770_p13 = por %p769_p12, %p768_p11 }
  0x1c   :  { %p771_p0 = pnand %p770_p13, %p764_p10 }
  0x1e   :  { %774 = shalt.err (!%p771_p0)  }
  0x1f   :  { %s867_s16 = smov [#allocation6]   ;;  %s775_s17 = scalar_lea.vmem %s25_s14, 16 }
  0x20   :  { %23 = dma.vmem_to_smem %s21_s11, 16, %s867_s16, [#allocation3] }
  0x21   :  { %p776_p1 = scmp.ne.s32.totalorder %s25_s14, %s775_s17  ;;  %p780_p2 = scmp.lt.s32.totalorder %s25_s14, %s25_s14 }
  0x22   :  { %p781_p3 = scmp.lt.s32.totalorder %s775_s17, %s775_s17 }
  0x24   :  { %p782_p4 = por %p781_p3, %p780_p2 }
  0x26   :  { %p783_p5 = pnand %p782_p4, %p776_p1 }
  0x28   :  { %786 = shalt.err (!%p783_p5)  }
  0x29   :  { %s868_s2 = smov [#allocation7]   ;;  %s28_s19 = sshll.u32 %s1124_s4, 4  ;;  %s29_s19 = int_to_ptr.vmem [resolvable:$true] %s28_s19 }
  0x2a   :  { %27 = dma.vmem_to_smem %s25_s14, 16, %s868_s2, [#allocation3] }
  0x2b   :  { %s787_s20 = scalar_lea.vmem %s29_s19, 16  ;;  %p792_p7 = scmp.lt.s32.totalorder %s29_s19, %s29_s19 }
  0x2c   :  { %p788_p6 = scmp.ne.s32.totalorder %s29_s19, %s787_s20  ;;  %p793_p8 = scmp.lt.s32.totalorder %s787_s20, %s787_s20 }
  0x2e   :  { %p794_p9 = por %p793_p8, %p792_p7 }
  0x30   :  { %p795_p10 = pnand %p794_p9, %p788_p6 }
  0x32   :  { %798 = shalt.err (!%p795_p10)  }
  0x33   :  { %s869_s21 = smov [#allocation8]  }
  0x34   :  { %31 = dma.vmem_to_smem %s29_s19, 16, %s869_s21, [#allocation3] }
  0x35   :  { %843 = dma.done.wait [#allocation3], 80 }
  0x36   :  { %844 = vsyncadd [#allocation3], 4294967216 }
  0x37   :  { %33 = sfence }
  0x38   :  { %34 = vsyncpa [#allocation10], 0 }
  0x39   :  { %36 = vsyncpa [#allocation10 + $0x1], 0  ;;  %s930_s22 = smov 0   ;;  %s932_s23 = smov 0  }
  0x3a   :  { %s934_s4 = smov 0   ;;  %s936_s24 = smov 0  }
  0x3b LB: > { %s951_s25 = sadd.s32 4294967295, %s863_s24   ;;  %s573_s26 = sadd.s32 4294967294, %s863_s24   ;;  %s863_s24 = sphi %s936_s24, %s1130_s24   ;;  %s859_s4 = sphi %s934_s4, %s1129_s4   ;;  %s855_s23 = sphi %s932_s23, %s1128_s23   ;;  %s851_s22 = sphi %s930_s22, %s1127_s22  }
  0x3c   : > { %s955_s27 = sadd.s32 1, %s863_s24   ;;  %s102_s28 = sld [smem:[#allocation4 + %s863_s24]] }
  0x3d   : > { %s103_s29 = sld [smem:[#allocation4 + %s955_s27]]  ;;  %p117_p11 = scmp.ne.s32.totalorder %s859_s4, %s855_s23 }
  0x3e   : > { %p118_p12 = scmp.eq.s32.totalorder %s951_s25, 2  ;;  %p123_p13 = scmp.ne.s32.totalorder %s855_s23, %s851_s22 }
  0x3f   : > { %p124_p0 = scmp.eq.s32.totalorder %s573_s26, 2  ;;  %p576_p2 = scmp.ge.s32.totalorder %s863_s24, 1 }
  0x40   : > { %p964_p1 = por %p118_p12, %p117_p11  ;;  %p162_p4 = scmp.lt.s32.totalorder %s863_s24, 4 }
  0x41   : > { %p969_p3 = por %p124_p0, %p123_p13  ;;  %s107_s9 = sadd.s32 1, %s859_s4 }
  0x42   : > { %p163_p5 = pnand %p576_p2, %p162_p4 }
  0x43   : > { %s104_s0 = ssub.s32 %s102_s28, %s103_s29  ;;  %s187_s10 = sand.u32 (!%p163_p5), 1, %s855_s23  }
  0x44   : > { %p105_p6 = scmp.eq.s32.totalorder %s104_s0, 0  ;;  %166 = sbr.rel (%p163_p5) target bundleno = 528 (0x210), region = 28 }
  0x45   : > { %s190_s11 = sld [smem:[#allocation5 + %s951_s25]] (!%p163_p5)  ;;  %s577_s12 = sshll.u32 (!%p163_p5), %s187_s10, 4 }
  0x46   : > { %s976_s1 = scalar_select %p105_p6, %s859_s4, %s107_s9  }
  0x47   : > { %s198_s13 = sld [smem:[#allocation5 + %s951_s25]] (!%p163_p5)  ;;  %s994_s26 = scalar_lea.vmem (!%p163_p5), [#allocation9], %s577_s12 }
  0x48   : > { %s205_s14 = sld [smem:[#allocation7 + %s951_s25]] (!%p163_p5) }
  0x4b   : > { %s578_s15 = sshll.u32 %s190_s11, 4 }
  0x4c   : > { %p192_p7 = scmp.lt.s32.totalorder %s578_s15, 15 }
  0x4d   : > { %p199_p8 = scmp.lt.s32.totalorder %s198_s13, 0 }
  0x4e   : > { %s1132_s15 = smov (!%p192_p7, %s578_s15), 15  ;;  %p581_p9 = scmp.ne.s32.totalorder %s205_s14, 1 }
  0x4f   : > { %s1134_s13 = smov (!%p199_p8, %s198_s13), 0  ;;  %s579_s16 = sshll.u32 %s1132_s15, 3  ;;  %v870_v0 = vmov (!%p581_p9), 0.0  }
  0x50   : > { %s987_s3 = scalar_lea.vmem %s1118_s5, %s579_s16  ;;  %s580_s18 = sshll.u32 %s1134_s13, 3  ;;  %210 = vst [vmem:[#allocation2] sm:$0xff] (!%p581_p9), %v870_v0  ;;  %211 = vst [vmem:[#allocation2 + $0x8] sm:$0xff] (!%p581_p9), %v870_v0 }
  0x51   : > { %s992_s21 = scalar_lea.vmem %s1119_s6, %s580_s18  ;;  %209 = sbr.rel (%p581_p9) target bundleno = 88 (0x58), region = 32 }
  0x58 PF: > { %s212_s28 = sld [smem:[#allocation6 + %s951_s25]] }
  0x5e   : > { %p582_p10 = scmp.ne.s32.totalorder %s212_s28, 1 }
  0x5f   : > { %s217_s29 = sld [smem:[#allocation4 + %s951_s25]] (!%p582_p10)  ;;  %v871_v1 = vmov (!%p582_p10), 0   ;;  %v221_v2 = vld [vmem:[%s987_s3 + $0x10] sm:$0xff] (!%p582_p10)  ;;  %v219_v3 = vld [vmem:[%s987_s3] sm:$0xff] (!%p582_p10)  ;;  %v222_v5 = vld [vmem:[%s987_s3 + $0x18] sm:$0xff] (!%p582_p10)  ;;  %v872_v35 = vmov (!%p582_p10), 0.0   ;;  %v252_v36 = vlaneseq (!%p582_p10) }
  0x60   : > { %216 = sbr.rel (%p582_p10) target bundleno = 487 (0x1e7), region = 36  ;;  %738 = vset.pattern.permute.xlu1 (!%p582_p10), %v871_v1  ;;  %737 = vset.pattern.permute.xlu0 (!%p582_p10), %v871_v1  ;;  %v220_v6 = vld [vmem:[%s987_s3 + $0x8] sm:$0xff] (!%p582_p10)  ;;  %v223_v12 = vld [vmem:[%s987_s3 + $0x20] sm:$0xff] (!%p582_p10)  ;;  %v226_v15 = vld [vmem:[%s987_s3 + $0x38] sm:$0xff] (!%p582_p10)  ;;  %v873_v45 = vmov (!%p582_p10), 1.0|1.0  }
  0x61   : > { %v224_v11 = vld [vmem:[%s987_s3 + $0x28] sm:$0xff] (!%p582_p10)  ;;  %v225_v16 = vld [vmem:[%s987_s3 + $0x30] sm:$0xff] (!%p582_p10)  ;;  %v227_v20 = vld [vmem:[%s987_s3 + $0x40] sm:$0xff] (!%p582_p10)  ;;  %466 = vmatprep.mubr.f32.mxu0 (!%p582_p10), %v872_v35  ;;  %v1014_v37 = vand.u32 (!%p582_p10), 127, %v252_v36 }
  0x62   : > { %v228_v19 = vld [vmem:[%s987_s3 + $0x48] sm:$0xff] (!%p582_p10)  ;;  %v230_v23 = vld [vmem:[%s987_s3 + $0x58] sm:$0xff] (!%p582_p10)  ;;  %v229_v24 = vld [vmem:[%s987_s3 + $0x50] sm:$0xff] (!%p582_p10) }
  0x63   : > { %v232_v27 = vld [vmem:[%s987_s3 + $0x68] sm:$0xff] (!%p582_p10)  ;;  %v231_v28 = vld [vmem:[%s987_s3 + $0x60] sm:$0xff] (!%p582_p10)  ;;  %v234_v31 = vld [vmem:[%s987_s3 + $0x78] sm:$0xff] (!%p582_p10)  ;;  %v1017_v40 = vadd.s32 (!%p582_p10), 128, %v1014_v37 }
  0x64   : > { %v233_v32 = vld [vmem:[%s987_s3 + $0x70] sm:$0xff] (!%p582_p10)  ;;  %v401_v56 = vld [vmem:[%s992_s21] sm:$0xff] (!%p582_p10)  ;;  %v400_v58 = vld [vmem:[#allocation2 + $0x8] sm:$0xff] (!%p582_p10) }
  0x65   : > { %s583_s9 = sshll.u32 (!%p582_p10), %s217_s29, 8  ;;  %v399_v57 = vld [vmem:[#allocation2] sm:$0xff] (!%p582_p10) }
  0x66   : > { %v235_v4 = vstv (!%p582_p10), %s583_s9 }
  0x67   : > { %v238_v7 = vsub.s32 %v221_v2, %v235_v4  ;;  %v236_v8 = vsub.s32 %v219_v3, %v235_v4  ;;  %v239_v9 = vsub.s32 %v222_v5, %v235_v4  ;;  %v237_v10 = vsub.s32 %v220_v6, %v235_v4 }
  0x68   : > { %v241_v13 = vsub.s32 %v224_v11, %v235_v4  ;;  %v240_v14 = vsub.s32 %v223_v12, %v235_v4  ;;  %v243_v17 = vsub.s32 %v226_v15, %v235_v4  ;;  %v242_v18 = vsub.s32 %v225_v16, %v235_v4 }
  0x69   : > { %262 = vperm.xlu1 %738, %v238_v7   ;;  %256 = vperm.xlu0 %737, %v236_v8   ;;  %v245_v21 = vsub.s32 %v228_v19, %v235_v4  ;;  %v244_v22 = vsub.s32 %v227_v20, %v235_v4  ;;  %v247_v25 = vsub.s32 %v230_v23, %v235_v4 }
  0x6a   : > { %v246_v26 = vsub.s32 %v229_v24, %v235_v4  ;;  %v249_v29 = vsub.s32 %v232_v27, %v235_v4  ;;  %v248_v30 = vsub.s32 %v231_v28, %v235_v4  ;;  %v251_v33 = vsub.s32 %v234_v31, %v235_v4 }
  0x6b   : > { %v250_v34 = vsub.s32 %v233_v32, %v235_v4 }
  0x6d   : > { %265 = vperm.xlu1 %738, %v239_v9   ;;  %259 = vperm.xlu0 %737, %v237_v10  }
  0x71   : > { %271 = vperm.xlu1 %738, %v241_v13   ;;  %268 = vperm.xlu0 %737, %v240_v14  }
  0x75   : > { %277 = vperm.xlu1 %738, %v243_v17   ;;  %274 = vperm.xlu0 %737, %v242_v18  }
  0x79   : > { %283 = vperm.xlu1 %738, %v245_v21   ;;  %280 = vperm.xlu0 %737, %v244_v22  }
  0x7d   : > { %289 = vperm.xlu1 %738, %v247_v25   ;;  %286 = vperm.xlu0 %737, %v246_v26  }
  0x81   : > { %295 = vperm.xlu1 %738, %v249_v29   ;;  %292 = vperm.xlu0 %737, %v248_v30  }
  0x85   : > { %301 = vperm.xlu1 %738, %v251_v33   ;;  %298 = vperm.xlu0 %737, %v250_v34  }
  0xe8   : > { %v263_v38 = vpop.permute.xlu1 %262  ;;  %v257_v39 = vpop.permute.xlu0 %256 }
  0xe9   : > { %vm308_vm2 = vcmp.eq.s32.totalorder %v263_v38, %v1017_v40  ;;  %vm304_vm4 = vcmp.eq.s32.totalorder %v257_v39, %v1017_v40  ;;  %vm303_vm5 = vcmp.eq.s32.totalorder %v257_v39, %v1014_v37  ;;  %vm307_vm8 = vcmp.eq.s32.totalorder %v263_v38, %v1014_v37 }
  0xec   : > { %v266_v41 = vpop.permute.xlu1 %265  ;;  %v260_v42 = vpop.permute.xlu0 %259 }
  0xed   : > { %vm306_vm0 = vcmp.eq.s32.totalorder %v260_v42, %v1017_v40  ;;  %vm305_vm1 = vcmp.eq.s32.totalorder %v260_v42, %v1014_v37  ;;  %vm310_vm3 = vcmp.eq.s32.totalorder %v266_v41, %v1017_v40  ;;  %vm309_vm9 = vcmp.eq.s32.totalorder %v266_v41, %v1014_v37 }
  0xee   : > { %vm655_vm6 = vmpackc.low %vm306_vm0, %vm304_vm4 }
  0xef   : > { %656 = vmatprep.subr.msk.bf16.mxu0 %vm655_vm6, %v873_v45  ;;  %vm657_vm7 = vmpackc.low %vm305_vm1, %vm303_vm5 }
  0xf0   : > { %v272_v43 = vpop.permute.xlu1 %271  ;;  %v269_v44 = vpop.permute.xlu0 %268  ;;  %vm659_vm10 = vmpackc.low %vm310_vm3, %vm308_vm2  ;;  %658 = vmatpush1.bf16.msk.msra.mxu0 %vm657_vm7, %v873_v45 }
  0xf1   : > { %vm314_vm11 = vcmp.eq.s32.totalorder %v272_v43, %v1017_v40  ;;  %vm312_vm12 = vcmp.eq.s32.totalorder %v269_v44, %v1017_v40  ;;  %660 = vmatprep.subr.msk.bf16.mxu0 %vm659_vm10, %v873_v45  ;;  %vm661_vm13 = vmpackc.low %vm309_vm9, %vm307_vm8  ;;  %vm313_vm14 = vcmp.eq.s32.totalorder %v272_v43, %v1014_v37  ;;  %vm311_vm15 = vcmp.eq.s32.totalorder %v269_v44, %v1014_v37 }
  0xf2   : > { %vm663_vm0 = vmpackc.low %vm314_vm11, %vm312_vm12 }
  0xf3   : > { %vm665_vm3 = vmpackc.low %vm313_vm14, %vm311_vm15 }
  0xf4   : > { %v278_v46 = vpop.permute.xlu1 %277  ;;  %v275_v47 = vpop.permute.xlu0 %274  ;;  %662 = vmatpush1.bf16.msk.msra.mxu0 %vm661_vm13, %v873_v45 }
  0xf5   : > { %vm318_vm1 = vcmp.eq.s32.totalorder %v278_v46, %v1017_v40  ;;  %vm316_vm2 = vcmp.eq.s32.totalorder %v275_v47, %v1017_v40  ;;  %664 = vmatprep.subr.msk.bf16.mxu0 %vm663_vm0, %v873_v45  ;;  %vm317_vm4 = vcmp.eq.s32.totalorder %v278_v46, %v1014_v37  ;;  %vm315_vm5 = vcmp.eq.s32.totalorder %v275_v47, %v1014_v37 }
  0xf6   : > { %vm667_vm6 = vmpackc.low %vm318_vm1, %vm316_vm2 }
  0xf7   : > { %vm669_vm9 = vmpackc.low %vm317_vm4, %vm315_vm5 }
  0xf8   : > { %v284_v48 = vpop.permute.xlu1 %283  ;;  %v281_v49 = vpop.permute.xlu0 %280  ;;  %666 = vmatpush1.bf16.msk.msra.mxu0 %vm665_vm3, %v873_v45 }
  0xf9   : > { %vm322_vm7 = vcmp.eq.s32.totalorder %v284_v48, %v1017_v40  ;;  %vm320_vm8 = vcmp.eq.s32.totalorder %v281_v49, %v1017_v40  ;;  %668 = vmatprep.subr.msk.bf16.mxu0 %vm667_vm6, %v873_v45  ;;  %vm321_vm10 = vcmp.eq.s32.totalorder %v284_v48, %v1014_v37  ;;  %vm319_vm11 = vcmp.eq.s32.totalorder %v281_v49, %v1014_v37 }
  0xfa   : > { %vm671_vm12 = vmpackc.low %vm322_vm7, %vm320_vm8 }
  0xfb   : > { %vm673_vm15 = vmpackc.low %vm321_vm10, %vm319_vm11 }
  0xfc   : > { %v290_v50 = vpop.permute.xlu1 %289  ;;  %v287_v51 = vpop.permute.xlu0 %286  ;;  %670 = vmatpush1.bf16.msk.msra.mxu0 %vm669_vm9, %v873_v45 }
  0xfd   : > { %vm326_vm13 = vcmp.eq.s32.totalorder %v290_v50, %v1017_v40  ;;  %vm324_vm14 = vcmp.eq.s32.totalorder %v287_v51, %v1017_v40  ;;  %672 = vmatprep.subr.msk.bf16.mxu0 %vm671_vm12, %v873_v45  ;;  %vm325_vm0 = vcmp.eq.s32.totalorder %v290_v50, %v1014_v37  ;;  %vm323_vm1 = vcmp.eq.s32.totalorder %v287_v51, %v1014_v37 }
  0xfe   : > { %vm675_vm2 = vmpackc.low %vm326_vm13, %vm324_vm14 }
  0xff   : > { %vm677_vm5 = vmpackc.low %vm325_vm0, %vm323_vm1 }
 0x100   : > { %v296_v52 = vpop.permute.xlu1 %295  ;;  %v293_v53 = vpop.permute.xlu0 %292  ;;  %674 = vmatpush1.bf16.msk.msra.mxu0 %vm673_vm15, %v873_v45 }
 0x101   : > { %vm330_vm3 = vcmp.eq.s32.totalorder %v296_v52, %v1017_v40  ;;  %vm328_vm4 = vcmp.eq.s32.totalorder %v293_v53, %v1017_v40  ;;  %676 = vmatprep.subr.msk.bf16.mxu0 %vm675_vm2, %v873_v45  ;;  %vm329_vm6 = vcmp.eq.s32.totalorder %v296_v52, %v1014_v37  ;;  %vm327_vm7 = vcmp.eq.s32.totalorder %v293_v53, %v1014_v37 }
 0x102   : > { %vm679_vm8 = vmpackc.low %vm330_vm3, %vm328_vm4 }
 0x103   : > { %vm681_vm11 = vmpackc.low %vm329_vm6, %vm327_vm7 }
 0x104   : > { %v302_v54 = vpop.permute.xlu1 %301  ;;  %v299_v55 = vpop.permute.xlu0 %298  ;;  %678 = vmatpush1.bf16.msk.msra.mxu0 %vm677_vm5, %v873_v45 }
 0x105   : > { %vm334_vm9 = vcmp.eq.s32.totalorder %v302_v54, %v1017_v40  ;;  %vm332_vm10 = vcmp.eq.s32.totalorder %v299_v55, %v1017_v40  ;;  %680 = vmatprep.subr.msk.bf16.mxu0 %vm679_vm8, %v873_v45  ;;  %vm333_vm12 = vcmp.eq.s32.totalorder %v302_v54, %v1014_v37  ;;  %vm331_vm13 = vcmp.eq.s32.totalorder %v299_v55, %v1014_v37 }
 0x106   : > { %vm683_vm14 = vmpackc.low %vm334_vm9, %vm332_vm10 }
 0x107   : > { %vm685_vm15 = vmpackc.low %vm333_vm12, %vm331_vm13 }
 0x108   : > { %682 = vmatpush1.bf16.msk.msra.mxu0 %vm681_vm11, %v873_v45 }
 0x109   : > { %684 = vmatprep.subr.msk.bf16.mxu0 %vm683_vm14, %v873_v45 }
 0x10c   : > { %686 = vmatpush1.bf16.msk.msra.mxu0 %vm685_vm15, %v873_v45 }
 0x10f   : > { %467 = vmatmul.mubr.f32.vlgmr.msra.gmra.mrb[0].mxu0 %v401_v56 }
 0x1e2   : > { %v468_v59 = vpop.f32.mrb[0].mxu0 }
 0x1e3   : > { %v473_v60 = vadd.f32 %v468_v59, %v399_v57  ;;  %v470_v61 = vpop.f32.mrb[1].mxu0 }
 0x1e4   : > { %v474_v62 = vadd.f32 %v470_v61, %v400_v58 }
 0x1e5   : > { %475 = vst [vmem:[#allocation2] sm:$0xff] %v473_v60 }
 0x1e6   : > { %476 = vst [vmem:[#allocation2 + $0x8] sm:$0xff] %v474_v62 }
 0x1e7 PF: > { %s477_s0 = sld [smem:[#allocation8 + %s951_s25]] }
 0x1ed   : > { %p648_p11 = scmp.ne.s32.totalorder %s477_s0, 1 }
 0x1ee   : > { %v482_v63 = vld [vmem:[#allocation2] sm:$0xff] (!%p648_p11)  ;;  %v483_v0 = vld [vmem:[#allocation2 + $0x8] sm:$0xff] (!%p648_p11) }
 0x1ef   : > { %481 = sbr.rel (%p648_p11) target bundleno = 502 (0x1f6), region = 40  ;;  %484 = vst [vmem:[%s994_s26] sm:$0xff] (!%p648_p11), %v482_v63  ;;  %485 = vst [vmem:[%s994_s26 + $0x8] sm:$0xff] (!%p648_p11), %v483_v0 }
 0x1f6 PF: > { %s687_s11 = scalar_select %p964_p1, [#allocation4], [#allocation11] }
 0x1f7   : > { %s1136_s25 = smov (!%p964_p1, %s951_s25), 0  ;;  %s502_s13 = sshll.u32 %s994_s26, 4  ;;  %s1077_s13 = int_to_ptr.vmem [resolvable:$true] %s502_s13 }
 0x1f8   : > { %s494_s12 = sld [smem:[%s687_s11 + %s1136_s25]]  ;;  %s487_s2 = scalar_lea.sflag [#allocation10], %s187_s10 }
 0x1f9   : > { %s799_s3 = scalar_lea.vmem %s1077_s13, 256  ;;  %s874_s18 = smov [#allocation9]  }
 0x1fa   : > { %p800_p12 = scmp.ne.s32.totalorder %s1077_s13, %s799_s3  ;;  %s803_s25 = sshll.u32 %s874_s18, 4  ;;  %s804_s25 = int_to_ptr.vmem [resolvable:$false] %s803_s25 }
 0x1fb   : > { %s805_s19 = scalar_lea.vmem %s804_s25, 512  ;;  %p806_p2 = scmp.lt.s32.totalorder %s1077_s13, %s804_s25 }
 0x1fc   : > { %p801_p13 = pnand %p800_p12, %p964_p1  ;;  %p807_p4 = scmp.lt.s32.totalorder %s805_s19, %s799_s3 }
 0x1fe   : > { %s654_s14 = sshll.u32 %s494_s12, 8  ;;  %p802_p0 = pneg %p801_p13 }
 0x1ff   : > { %s500_s17 = scalar_lea.hbm %s1120_s7, %s654_s14  ;;  %p808_p5 = por %p807_p4, %p806_p2 }
 0x201   : > { %p809_p6 = pnand %p808_p5, %p802_p0 }
 0x203   : > { %812 = shalt.err (!%p809_p6)
}
 0x204   : > { %s813_s20 = scalar_lea.hbm %s500_s17, 256  ;;  %s817_s26 = scalar_lea.hbm %s1120_s7, 512 }
 0x205   : > { %p814_p7 = scmp.ne.s32.totalorder %s500_s17, %s813_s20  ;;  %p818_p10 = scmp.lt.u32.totalorder %s500_s17, %s1120_s7 }
 0x206   : > { %p819_p11 = scmp.lt.u32.totalorder %s817_s26, %s813_s20  ;;  %p821_p13 = scmp.lt.u32.totalorder %s813_s20, %s500_s17 }
 0x207   : > { %p815_p8 = pnand %p814_p7, %p964_p1 }
 0x208   : > { %p820_p12 = por %p819_p11, %p818_p10 }
 0x209   : > { %p816_p9 = pneg %p815_p8 }
 0x20a   : > { %p822_p2 = por %p821_p13, %p820_p12 }
 0x20c   : > { %p823_p0 = pnand %p822_p2, %p816_p9 }
 0x20e   : > { %826 = shalt.err (!%p823_p0)
}
 0x20f   : > { %689 = dma.vmem_to_hbm [thread:$0]  (%p964_p1), %s1077_s13, 256, %s500_s17, %s487_s2  }
 0x210 PF: > { %p695_p4 = scmp.ge.s32.totalorder %s863_s24, 2  ;;  %s514_s9 = sand.u32 1, %s851_s22  }
 0x211   : > { %s515_s0 = scalar_lea.sflag [#allocation10], %s514_s9 }
 0x212   : > { %p692_p5 = pnand %p695_p4, %p969_p3 }
 0x214   : > { %846 = dma.done.wait (!%p692_p5), %s515_s0, 256  }
 0x215   : > { %848 = vsyncadd (!%p692_p5), %s515_s0, 4294967040  ;;  %p39_p6 = scmp.ge.s32.totalorder %s955_s27, 5   ;;  %s1127_s22 = smov %s855_s23 }
 0x216   : > { %s1128_s23 = smov %s859_s4  ;;  %s1129_s4 = smov %s976_s1 }
 0x217   : > { %s1130_s24 = smov %s955_s27  ;;  %41 = sbr.rel (!%p39_p6) target bundleno = 59 (0x3b), region = 78 }
 0x21e   :  { %520 = vsyncpa [#allocation10], 1 }
 0x21f   :  { %522 = vsyncpa [#allocation10 + $0x1], 1 }

</bundles_post_ra>
